<compile_context>
chip_gen: v5e
topology: v5e:2x2
jax: 0.10.0
libtpu: 0.0.40
codegen_flags: <defaults>
</compile_context>

<pallas_src>
import functools
import math

import jax
import jax.numpy as jnp
from jax.experimental import pallas as pl
from jax.experimental.pallas import tpu as pltpu

_GELU_C = math.sqrt(2.0 / math.pi)


def _gelu_tanh(h):
    """GELU(approximate='tanh'), computed in h's dtype."""
    return 0.5 * h * (1.0 + jnp.tanh(_GELU_C * (h + 0.044715 * h * h * h)))


def _supports_native_bf16():
    """bf16 VPU/EUP exists on v6e/v7x; older chips (<= v5) want f32 GELU."""
    try:
        kind = jax.devices()[0].device_kind.lower()
    except Exception:
        return False
    return not any(v in kind for v in ("v2", "v3", "v4", "v5"))


# ---------------------------------------------------------------------------
# Kernels
# ---------------------------------------------------------------------------

def _mlp_kernel_resident(x_ref, wfc_ref, bfc_ref, wpr_ref, bpr_ref, o_ref, *,
                         gelu_dtype):
    """Whole hidden dim resident in VMEM: grid = (M//tm,), no accumulator.

    x:   (tm, C)   wfc: (C, H)   bfc: (1, H)   wpr: (H, C)   bpr: (1, C)
    """
    h = jnp.dot(x_ref[...], wfc_ref[...], preferred_element_type=jnp.float32)
    h = h + bfc_ref[...].astype(jnp.float32)
    h = _gelu_tanh(h.astype(gelu_dtype))
    out = jnp.dot(h.astype(wpr_ref.dtype), wpr_ref[...],
                  preferred_element_type=jnp.float32)
    o_ref[...] = (out + bpr_ref[...].astype(jnp.float32)).astype(o_ref.dtype)


def _mlp_kernel_tiled(x_ref, wfc_ref, bfc_ref, wpr_ref, bpr_ref, o_ref,
                      acc_ref, *, gelu_dtype):
    """Hidden dim tiled: grid = (M//tm, H//th), f32 accumulator across h.

    x:   (tm, C)   wfc: (C, th)   bfc: (1, th)   wpr: (th, C)   bpr: (1, C)
    acc: (tm, C) f32 scratch, resident across the hidden grid axis.
    """
    h_idx = pl.program_id(1)

    @pl.when(h_idx == 0)
    def _():
        # Fold c_proj bias into the accumulator init (saves a flush-path add).
        acc_ref[...] = jnp.broadcast_to(
            bpr_ref[...].astype(jnp.float32), acc_ref.shape)

    h = jnp.dot(x_ref[...], wfc_ref[...], preferred_element_type=jnp.float32)
    h = h + bfc_ref[...].astype(jnp.float32)
    h = _gelu_tanh(h.astype(gelu_dtype))
    acc_ref[...] += jnp.dot(h.astype(wpr_ref.dtype), wpr_ref[...],
                            preferred_element_type=jnp.float32)

    @pl.when(h_idx == pl.num_programs(1) - 1)
    def _():
        o_ref[...] = acc_ref[...].astype(o_ref.dtype)


# ---------------------------------------------------------------------------
# Tile selection helpers
# ---------------------------------------------------------------------------

def _pick_tm(M, target=512):
    """Largest multiple-of-16 divisor of M <= target, preferring >= 2 row
    tiles so the 'parallel' axis can shard across v7x's 2 TensorCores."""
    cands = [d for d in range(16, min(M, target) + 1, 16) if M % d == 0]
    if not cands:
        return M  # tiny M: use the full extent
    two_plus = [d for d in cands if M // d >= 2]
    return max(two_plus) if two_plus else max(cands)


def _largest_divisor_multiple(H, base=256, cap=2048):
    """Largest divisor of H that is a multiple of `base` and <= cap."""
    best = None
    for d in range(base, min(H, cap) + 1, base):
        if H % d == 0:
            best = d
    return best


# ---------------------------------------------------------------------------
# Wrapper
# ---------------------------------------------------------------------------

def pallas_mlp(x, wfc, bfc, wpr, bpr, *, tm=None, th=None, gelu_dtype=None):
    """Fused MLP forward: GELU_tanh(x @ wfc + bfc) @ wpr + bpr.

    x: (..., C); wfc: (C, 4C); wpr: (4C, C)  (weights stored (in, out),
    i.e. already transposed vs. torch nn.Linear.weight).
    """
    orig_shape = x.shape
    C = orig_shape[-1]
    H = wfc.shape[1]
    assert wfc.shape == (C, H) and wpr.shape == (H, C)
    assert bfc.shape == (H,) and bpr.shape == (C,)

    x2 = x.reshape(-1, C)
    M = x2.shape[0]
    in_itemsize = x2.dtype.itemsize
    w_itemsize = jnp.dtype(wfc.dtype).itemsize

    if gelu_dtype is None:
        gelu_dtype = (jnp.bfloat16
                      if (x.dtype == jnp.bfloat16 and _supports_native_bf16())
                      else jnp.float32)

    if tm is None:
        tm = _pick_tm(M)

    # Resident-weight mode when both weight matrices plus the per-step hidden
    # activation and x/out double buffers fit well under v7x's 64 MiB VMEM.
    resident_budget = 44 << 20
    if th is None:
        footprint = (2 * C * H * w_itemsize        # both weight matrices
                     + tm * H * 4                  # hidden tile (f32 worst case)
                     + 4 * tm * C * in_itemsize)   # x/out double buffers
        if footprint <= resident_budget:
            th = H
        else:
            th = _largest_divisor_multiple(H, base=256, cap=2048) or H
    resident = (th == H)

    assert M % tm == 0, "tm must divide the flattened row count"
    assert H % th == 0, "th must divide the hidden size"
    assert tm == M or tm % 16 == 0, "tm should be a multiple of 16 (bf16 sublane packing)"
    assert th == H or th % 128 == 0, "th must be lane-dense (multiple of 128)"
    # NOTE: C a multiple of 128 keeps output stores unmasked; other C still works.

    bfc2 = bfc.reshape(1, H).astype(jnp.float32)
    bpr2 = bpr.reshape(1, C).astype(jnp.float32)

    # Explicit VMEM budget (capped below v7x's 64 MiB physical).
    wb = (C * th + th * C) * w_itemsize
    est = (2 * tm * C * in_itemsize            # x row tile (double buffered)
           + 2 * tm * C * in_itemsize          # out row tile
           + (wb if resident else 2 * wb)      # weights (dbl-buffered if streamed)
           + 2 * (th + C) * 4                  # biases
           + tm * th * 4)                      # hidden intermediate
    if not resident:
        est += tm * C * 4                      # f32 accumulator scratch
    vmem_limit = int(min(max(32 << 20, 2 * est), 60 << 20))

    n_row_tiles = M // tm
    flops = 4 * M * C * H                      # two matmuls, 2 flops/MAC
    weight_replays = 1 if resident else n_row_tiles
    bytes_accessed = (x2.size * in_itemsize
                      + weight_replays * (wfc.size + wpr.size) * w_itemsize
                      + (bfc.size + bpr.size) * 4
                      + M * C * in_itemsize)

    if resident:
        kernel = functools.partial(_mlp_kernel_resident, gelu_dtype=gelu_dtype)
        grid_spec = pltpu.PrefetchScalarGridSpec(
            num_scalar_prefetch=0,
            grid=(n_row_tiles,),
            in_specs=[
                pl.BlockSpec((tm, C), lambda i: (i, 0)),   # x row tile
                pl.BlockSpec((C, H), lambda i: (0, 0)),    # c_fc weight (resident)
                pl.BlockSpec((1, H), lambda i: (0, 0)),    # c_fc bias
                pl.BlockSpec((H, C), lambda i: (0, 0)),    # c_proj weight (resident)
                pl.BlockSpec((1, C), lambda i: (0, 0)),    # c_proj bias
            ],
            out_specs=pl.BlockSpec((tm, C), lambda i: (i, 0)),
        )
        dim_sem = ("parallel",)
    else:
        # TODO(synk): if a profile shows the per-h weight DMA still exposed at
        # very large C, bump the two weight BlockSpecs to pl.Buffered(3).
        kernel = functools.partial(_mlp_kernel_tiled, gelu_dtype=gelu_dtype)
        grid_spec = pltpu.PrefetchScalarGridSpec(
            num_scalar_prefetch=0,
            grid=(n_row_tiles, H // th),
            in_specs=[
                pl.BlockSpec((tm, C), lambda i, h: (i, 0)),   # x row tile
                pl.BlockSpec((C, th), lambda i, h: (0, h)),   # c_fc weight tile
                pl.BlockSpec((1, th), lambda i, h: (0, h)),   # c_fc bias tile
                pl.BlockSpec((th, C), lambda i, h: (h, 0)),   # c_proj weight tile
                pl.BlockSpec((1, C), lambda i, h: (0, 0)),    # c_proj bias
            ],
            out_specs=pl.BlockSpec((tm, C), lambda i, h: (i, 0)),
            scratch_shapes=[pltpu.VMEM((tm, C), jnp.float32)],
        )
        dim_sem = ("parallel", "arbitrary")

    out = pl.pallas_call(
        kernel,
        out_shape=jax.ShapeDtypeStruct((M, C), x.dtype),
        grid_spec=grid_spec,
        compiler_params=pltpu.CompilerParams(
            dimension_semantics=dim_sem,
            vmem_limit_bytes=vmem_limit),
        cost_estimate=pl.CostEstimate(
            flops=flops, transcendentals=M * H, bytes_accessed=bytes_accessed),
    )(x2, wfc, bfc2, wpr, bpr2)

    return out.reshape(orig_shape)


def mlp_ref(x, wfc, bfc, wpr, bpr):
    """Pure-JAX f32 reference (same math as torch MLP.forward)."""
    h = x.astype(jnp.float32) @ wfc.astype(jnp.float32) + bfc
    h = _gelu_tanh(h)
    return h @ wpr.astype(jnp.float32) + bpr


if __name__ == "__main__":
    # Small GPT-2-style config: n_embd=128 -> hidden 4*128=512; x is (B, T, C).
    B, T, C = 2, 32, 128
    H = 4 * C
    std = 0.02

    key = jax.random.PRNGKey(0)
    kx, kfc, kbf, kpr, kbp = jax.random.split(key, 5)

    x_f32   = jax.random.normal(kx,  (B, T, C), jnp.float32)
    wfc_f32 = jax.random.normal(kfc, (C, H),    jnp.float32) * std
    bfc     = jax.random.normal(kbf, (H,),      jnp.float32) * std
    wpr_f32 = jax.random.normal(kpr, (H, C),    jnp.float32) * std
    bpr     = jax.random.normal(kbp, (C,),      jnp.float32) * std

    # bf16 for the MXU inputs; biases + accumulation stay f32.
    x   = x_f32.astype(jnp.bfloat16)
    wfc = wfc_f32.astype(jnp.bfloat16)
    wpr = wpr_f32.astype(jnp.bfloat16)

    y_ref = mlp_ref(x, wfc, bfc, wpr, bpr)

    # 1) Default path: resident weights (th == H), grid = (M//tm,).
    y = pallas_mlp(x, wfc, bfc, wpr, bpr)
    y = jax.block_until_ready(y)
    assert y.shape == (B, T, C)
    y32 = y.astype(jnp.float32)
    assert bool(jnp.all(jnp.isfinite(y32)))
    assert bool(jnp.allclose(y32, y_ref, rtol=2e-2, atol=1e-2)), (
        float(jnp.max(jnp.abs(y32 - y_ref))))

    # 2) Tiled-hidden fallback path (exercised explicitly at this small shape).
    y_t = pallas_mlp(x, wfc, bfc, wpr, bpr, tm=32, th=128)
    y_t = jax.block_until_ready(y_t)
    y_t32 = y_t.astype(jnp.float32)
    assert bool(jnp.all(jnp.isfinite(y_t32)))
    assert bool(jnp.allclose(y_t32, y_ref, rtol=2e-2, atol=1e-2)), (
        float(jnp.max(jnp.abs(y_t32 - y_ref))))

    print("KERNEL_OK")
</pallas_src>

<mosaic_0001>
module attributes {stable_mosaic.version = 11 : i64} {
  func.func @_mlp_kernel_resident(%arg0: i32, %arg1: memref<32x128xbf16, #tpu.memory_space<vmem>>, %arg2: memref<128x512xbf16, #tpu.memory_space<vmem>>, %arg3: memref<1x512xf32, #tpu.memory_space<vmem>>, %arg4: memref<512x128xbf16, #tpu.memory_space<vmem>>, %arg5: memref<1x128xf32, #tpu.memory_space<vmem>>, %arg6: memref<32x128xbf16, #tpu.memory_space<vmem>>) attributes {dimension_semantics = [#tpu.dimension_semantics<parallel>], iteration_bounds = array<i64: 2>, scalar_prefetch = 0 : i64, scratch_operands = 0 : i64, tpu.core_type = #tpu.core_type<tc>, window_params = [{transform_indices = @transform_0, window_bounds = array<i64: 32, 128>}, {pipeline_mode = #tpu.pipeline_mode<synchronous>, transform_indices = @transform_1, window_bounds = array<i64: 128, 512>}, {pipeline_mode = #tpu.pipeline_mode<synchronous>, transform_indices = @transform_2, window_bounds = array<i64: 1, 512>}, {pipeline_mode = #tpu.pipeline_mode<synchronous>, transform_indices = @transform_3, window_bounds = array<i64: 512, 128>}, {pipeline_mode = #tpu.pipeline_mode<synchronous>, transform_indices = @transform_4, window_bounds = array<i64: 1, 128>}, {transform_indices = @transform_5, window_bounds = array<i64: 32, 128>}]} {
    %c0 = arith.constant 0 : index
    %c0_0 = arith.constant 0 : index
    %0 = vector.load %arg1[%c0, %c0_0] : memref<32x128xbf16, #tpu.memory_space<vmem>>, vector<32x128xbf16>
    %c0_1 = arith.constant 0 : index
    %c0_2 = arith.constant 0 : index
    %1 = vector.load %arg2[%c0_1, %c0_2] : memref<128x512xbf16, #tpu.memory_space<vmem>>, vector<128x512xbf16>
    %cst = arith.constant dense<0.000000e+00> : vector<32x512xf32>
    %2 = tpu.matmul %0, %1, %cst {dimension_numbers = #tpu.dot_dimension_numbers<[1], [0], [0], [1], [0, 0, 1, 1], [], []>} : vector<32x128xbf16>, vector<128x512xbf16>, vector<32x512xf32> -> vector<32x512xf32>
    %c0_3 = arith.constant 0 : index
    %c0_4 = arith.constant 0 : index
    %3 = vector.load %arg3[%c0_3, %c0_4] : memref<1x512xf32, #tpu.memory_space<vmem>>, vector<1x512xf32>
    %4 = vector.broadcast %3 : vector<1x512xf32> to vector<32x512xf32>
    %5 = arith.addf %2, %4 : vector<32x512xf32>
    %6 = arith.truncf %5 : vector<32x512xf32> to vector<32x512xbf16>
    %cst_5 = arith.constant 5.000000e-01 : bf16
    %7 = vector.broadcast %cst_5 : bf16 to vector<32x512xbf16>
    %8 = arith.mulf %7, %6 : vector<32x512xbf16>
    %cst_6 = arith.constant 4.467770e-02 : bf16
    %9 = vector.broadcast %cst_6 : bf16 to vector<32x512xbf16>
    %10 = arith.mulf %9, %6 : vector<32x512xbf16>
    %11 = arith.mulf %10, %6 : vector<32x512xbf16>
    %12 = arith.mulf %11, %6 : vector<32x512xbf16>
    %13 = arith.addf %6, %12 : vector<32x512xbf16>
    %cst_7 = arith.constant 7.968750e-01 : bf16
    %14 = vector.broadcast %cst_7 : bf16 to vector<32x512xbf16>
    %15 = arith.mulf %14, %13 : vector<32x512xbf16>
    %16 = math.tanh %15 : vector<32x512xbf16>
    %cst_8 = arith.constant 1.000000e+00 : bf16
    %17 = vector.broadcast %cst_8 : bf16 to vector<32x512xbf16>
    %18 = arith.addf %17, %16 : vector<32x512xbf16>
    %19 = arith.mulf %8, %18 : vector<32x512xbf16>
    %c0_9 = arith.constant 0 : index
    %c0_10 = arith.constant 0 : index
    %20 = vector.load %arg4[%c0_9, %c0_10] : memref<512x128xbf16, #tpu.memory_space<vmem>>, vector<512x128xbf16>
    %cst_11 = arith.constant dense<0.000000e+00> : vector<32x128xf32>
    %21 = tpu.matmul %19, %20, %cst_11 {dimension_numbers = #tpu.dot_dimension_numbers<[1], [0], [0], [1], [0, 0, 1, 1], [], []>} : vector<32x512xbf16>, vector<512x128xbf16>, vector<32x128xf32> -> vector<32x128xf32>
    %c0_12 = arith.constant 0 : index
    %c0_13 = arith.constant 0 : index
    %22 = vector.load %arg5[%c0_12, %c0_13] : memref<1x128xf32, #tpu.memory_space<vmem>>, vector<1x128xf32>
    %23 = vector.broadcast %22 : vector<1x128xf32> to vector<32x128xf32>
    %24 = arith.addf %21, %23 : vector<32x128xf32>
    %25 = arith.truncf %24 : vector<32x128xf32> to vector<32x128xbf16>
    %c0_14 = arith.constant 0 : index
    %c0_15 = arith.constant 0 : index
    %26 = vector.load %arg6[%c0_14, %c0_15] : memref<32x128xbf16, #tpu.memory_space<vmem>>, vector<32x128xbf16>
    tpu.vector_store %arg6[%c0_14, %c0_15], %25 {strides = array<i32>} : memref<32x128xbf16, #tpu.memory_space<vmem>>, vector<32x128xbf16>,
    return
  }
  func.func @transform_0(%arg0: i32) -> (i32, i32) {
    %c0_i32 = arith.constant 0 : i32
    %c0_i32_0 = arith.constant 0 : i32
    return %arg0, %c0_i32 : i32, i32
  }
  func.func @transform_1(%arg0: i32) -> (i32, i32) {
    %c0_i32 = arith.constant 0 : i32
    %c0_i32_0 = arith.constant 0 : i32
    %c0_i32_1 = arith.constant 0 : i32
    return %c0_i32, %c0_i32_0 : i32, i32
  }
  func.func @transform_2(%arg0: i32) -> (i32, i32) {
    %c0_i32 = arith.constant 0 : i32
    %c0_i32_0 = arith.constant 0 : i32
    %c0_i32_1 = arith.constant 0 : i32
    return %c0_i32, %c0_i32_0 : i32, i32
  }
  func.func @transform_3(%arg0: i32) -> (i32, i32) {
    %c0_i32 = arith.constant 0 : i32
    %c0_i32_0 = arith.constant 0 : i32
    %c0_i32_1 = arith.constant 0 : i32
    return %c0_i32, %c0_i32_0 : i32, i32
  }
  func.func @transform_4(%arg0: i32) -> (i32, i32) {
    %c0_i32 = arith.constant 0 : i32
    %c0_i32_0 = arith.constant 0 : i32
    %c0_i32_1 = arith.constant 0 : i32
    return %c0_i32, %c0_i32_0 : i32, i32
  }
  func.func @transform_5(%arg0: i32) -> (i32, i32) {
    %c0_i32 = arith.constant 0 : i32
    %c0_i32_0 = arith.constant 0 : i32
    return %arg0, %c0_i32 : i32, i32
  }
}

</mosaic_0001>

<bundles_post_ra>
// kernel: tpu_custom_call.1
= control target key start
LH: loop header
LB: loop body
LE: loop exit
PB: predicated region body
PF: predicated region fallthrough
CT: control target
= control target key end

     0   :  { %10 = vsyncpa [#allocation3], 0  ;;  %s2500_s0 = inlined_call_operand.hbm [shape: bf16[64,128], index: 0, kind: input, shape index: {}]   ;;  %s2501_s1 = inlined_call_operand.hbm [shape: bf16[128,512], index: 1, kind: input, shape index: {}]   ;;  %s2502_s2 = inlined_call_operand.hbm [shape: f32[1,512], index: 2, kind: input, shape index: {}]   ;;  %s2503_s3 = inlined_call_operand.hbm [shape: bf16[512,128], index: 3, kind: input, shape index: {}]   ;;  %s2504_s4 = inlined_call_operand.vmem [shape: f32[1,128], index: 4, kind: input, shape index: {}]   ;;  %s2505_s5 = inlined_call_operand.hbm [shape: bf16[64,128], index: 5, kind: output, shape index: {}]  }
   0x1   :  { %12 = vsyncpa [#allocation3 + $0x1], 0 }
   0x2   :  { %13 = vsyncpa [#allocation6], 0 }
   0x3   :  { %14 = vsyncpa [#allocation9], 0 }
   0x4   :  { %15 = vsyncpa [#allocation4], 0 }
   0x5   :  { %17 = vsyncpa [#allocation4 + $0x1], 0  ;;  %s2133_s18 = smov 0   ;;  %s2135_s19 = smov 0  }
   0x6   :  { %s2137_s20 = smov 0   ;;  %s2139_s21 = smov 0  }
   0x7 LB: > { %s2154_s22 = sadd.s32 4294967295, %s2092_s21   ;;  %s1419_s23 = sadd.s32 4294967294, %s2092_s21   ;;  %s2092_s21 = sphi %s2139_s21, %s2518_s21   ;;  %s2088_s20 = sphi %s2137_s20, %s2517_s20   ;;  %s2084_s19 = sphi %s2135_s19, %s2516_s19   ;;  %s2080_s18 = sphi %s2133_s18, %s2515_s18  }
   0x8   : > { %p43_p0 = scmp.ne.s32.totalorder %s2084_s19, %s2080_s18  ;;  %p44_p1 = scmp.eq.s32.totalorder %s2154_s22, 0 }
   0x9   : > { %p151_p2 = scmp.eq.s32.totalorder %s2154_s22, 1  ;;  %p157_p3 = scmp.eq.s32.totalorder %s1419_s23, 1 }
   0xa   : > { %p2163_p4 = por %p44_p1, %p43_p0  ;;  %p1420_p5 = scmp.ge.s32.totalorder %s2092_s21, 1 }
   0xb   : > { %p2168_p6 = por %p157_p3, %p43_p0  ;;  %p164_p7 = scmp.lt.s32.totalorder %s2092_s21, 3 }
   0xc   : > { %s175_s28 = sshll.u32 %s2501_s1, 4  ;;  %s2094_s30 = smov [#allocation5]   ;;  %s176_s28 = int_to_ptr.hbm [resolvable:$true] %s175_s28 }
   0xd   : > { %p2176_p8 = pnand %p1420_p5, %p164_p7  ;;  %s177_s6 = sshll.u32 %s2094_s30, 4  ;;  %s178_s6 = int_to_ptr.vmem [resolvable:$true] %s177_s6 }
   0xe   : > { %s190_s10 = sshll.u32 %s2502_s2, 4  ;;  %s2095_s11 = smov 256   ;;  %s191_s10 = int_to_ptr.hbm [resolvable:$true] %s190_s10 }
   0xf   : > { %p1798_p9 = pneg %p2176_p8  ;;  %s2096_s12 = smov 16  }
  0x10   : > { %s2097_s13 = smov [#allocation7]   ;;  %s201_s17 = sshll.u32 %s2503_s3, 4  ;;  %s202_s17 = int_to_ptr.hbm [resolvable:$true] %s201_s17 }
  0x11   : > { %p2184_p10 = pnand %p1798_p9, %p44_p1  ;;  %s192_s14 = sshll.u32 %s2097_s13, 4  ;;  %s193_s14 = int_to_ptr.vmem [resolvable:$true] %s192_s14 }
  0x12   : > { %s2098_s23 = smov [#allocation8]   ;;  %s2506_s27 = smov 64  }
  0x13   : > { %1801 = dma.hbm_to_vmem [thread:$0]  (!%p2184_p10), %s176_s28, 4096, %s178_s6, [#allocation6], %s2095_s11, %s2095_s11, %s2096_s12  }
  0x14   : > { %1804 = dma.hbm_to_vmem [thread:$0]  (!%p2184_p10), %s191_s10, 64, %s193_s14, [#allocation6]  }
  0x15   : > { %s203_s26 = sshll.u32 %s2098_s23, 4  ;;  %s2100_s28 = smov 4   ;;  %s204_s26 = int_to_ptr.vmem [resolvable:$true] %s203_s26 }
  0x16   : > { %1807 = dma.hbm_to_vmem [thread:$0]  (!%p2184_p10), %s202_s17, 4096, %s204_s26, [#allocation9], %s2506_s27, %s2506_s27, %s2100_s28  }
  0x17   : > { %s2205_s30 = sadd.s32 1, %s2092_s21   ;;  %s30_s8 = sadd.s32 1, %s2088_s20 }
  0x18   : > { %s27_s6 = ssub.s32 %s2092_s21, %s2205_s30  ;;  %p37_p13 = scmp.ne.s32.totalorder %s2088_s20, %s2084_s19 }
  0x19   : > { %p28_p12 = scmp.eq.s32.totalorder %s27_s6, 0  ;;  %p38_p0 = scmp.eq.s32.totalorder %s2092_s21, 0 }
  0x1a   : > { %p2218_p3 = por %p151_p2, %p37_p13  ;;  %p1819_p5 = scmp.lt.s32.totalorder %s2092_s21, 2 }
  0x1b   : > { %s2214_s9 = scalar_select %p28_p12, %s2088_s20, %s30_s8  }
  0x1c   : > { %s220_s7 = sand.u32 1, %s2088_s20   ;;  %s1703_s11 = sshll.u32 %s2092_s21, 4 }
  0x1d   : > { %p39_p7 = por %p38_p0, %p37_p13  ;;  %s1425_s12 = sshll.u32 %s220_s7, 4 }
  0x1e   : > { %s229_s15 = scalar_lea.hbm %s2500_s0, %s1703_s11  ;;  %s224_s17 = scalar_lea.vmem [#allocation2], %s1425_s12 }
  0x1f   : > { %s230_s16 = sshll.u32 %s229_s15, 4  ;;  %s232_s23 = sshll.u32 %s224_s17, 4  ;;  %s231_s16 = int_to_ptr.hbm [resolvable:$true] %s230_s16  ;;  %s233_s23 = int_to_ptr.vmem [resolvable:$true] %s232_s23 }
  0x20   : > { %p2228_p9 = pnand %p1819_p5, %p39_p7  ;;  %s221_s6 = scalar_lea.sflag [#allocation3], %s220_s7 }
  0x21   : > { %s1988_s8 = sshra.s32 %s231_s16, 4  ;;  %s1995_s12 = scalar_lea.hbm %s2500_s0, 32  ;;  %s1989_s8 = int_to_ptr.hbm [resolvable:$true] %s1988_s8 }
  0x22   : > { %s1990_s27 = scalar_lea.hbm %s1989_s8, 16  ;;  %p1992_p10 = pneg %p2228_p9 }
  0x23   : > { %p1991_p2 = scmp.ne.s32.totalorder %s1989_s8, %s1990_s27  ;;  %p1996_p0 = scmp.lt.s32.totalorder %s1989_s8, %s2500_s0 }
  0x24   : > { %p1997_p5 = scmp.lt.s32.totalorder %s1995_s12, %s1990_s27 }
  0x25   : > { %p1993_p12 = pnand %p1992_p10, %p1991_p2 }
  0x26   : > { %p1998_p7 = por %p1997_p5, %p1996_p0 }
  0x27   : > { %p1994_p13 = pneg %p1993_p12 }
  0x29   : > { %p1999_p11 = pnand %p1998_p7, %p1994_p13 }
  0x2b   : > { %2002 = shalt.err (!%p1999_p11)
}
  0x2c   : > { %s2513_s7 = smov 64   ;;  %244 = sbr.rel (%p2176_p8) target bundleno = 478 (0x1de), region = 40 }
  0x2d   : > { %1811 = dma.hbm_to_vmem [thread:$0]  (!%p2228_p9), %s231_s16, 256, %s233_s23, %s221_s6, %s2513_s7, %s2513_s7, %s2100_s28  }
  0x2e   : > { %s2248_s17 = sand.u32 (!%p2176_p8), 1, %s2084_s19  }
  0x2f   : > { %s1429_s27 = sshll.u32 (!%p2176_p8), %s2248_s17, 4  ;;  %s247_s8 = scalar_lea.sflag (!%p2176_p8), [#allocation3], %s2248_s17 }
  0x30   : > { %s2254_s11 = scalar_lea.vmem (!%p2176_p8), [#allocation2], %s1429_s27 }
  0x31   : > { %2063 = dma.done.wait (%p2163_p4), %s247_s8, 256  }
  0x32   : > { %2065 = vsyncadd (%p2163_p4), %s247_s8, 4294967040 }
  0x33   : > { %2067 = dma.done.wait (%p44_p1), [#allocation6], 4160  }
  0x34   : > { %2069 = vsyncadd (%p44_p1), [#allocation6], 4294963136 }
  0x35   : > { %2071 = dma.done.wait (%p44_p1), [#allocation9], 4096  }
  0x36   : > { %2073 = vsyncadd (%p44_p1), [#allocation9], 4294963200  ;;  %v1556_v0 = vld [vmem:[#allocation5 + $0xe0] sm:$0xf]  ;;  %v1736_v1 = vld [vmem:[#allocation5 + $0xec] sm:$0xf0] }
  0x37   : > { %v1734_v2 = vld [vmem:[#allocation5 + $0xe4] sm:$0xf]  ;;  %v1557_v3 = vor.u32 %v1736_v1, %v1556_v0  ;;  %v1558_v4 = vld [vmem:[#allocation5 + $0xf0] sm:$0xf0]  ;;  %v1564_v5 = vld [vmem:[#allocation5 + $0xe8] sm:$0xf] }
  0x38   : > { %v1737_v6 = vld [vmem:[#allocation5 + $0xf4] sm:$0xf0]  ;;  %v1561_v7 = vor.u32 %v1734_v2, %v1558_v4  ;;  %v1735_v9 = vld [vmem:[#allocation5 + $0xec] sm:$0xf]  ;;  %v1566_v10 = vld [vmem:[#allocation5 + $0xf8] sm:$0xf0] }
  0x39   : > { %v1565_v8 = vor.u32 %v1737_v6, %v1564_v5  ;;  %v1540_v11 = vld [vmem:[#allocation5 + $0xc0] sm:$0xf]  ;;  %513 = vmatpush.bf16.msra.mxu0 %v1557_v3  ;;  %v1569_v12 = vor.u32 %v1735_v9, %v1566_v10  ;;  %v1732_v13 = vld [vmem:[#allocation5 + $0xcc] sm:$0xf0]  ;;  %v1730_v14 = vld [vmem:[#allocation5 + $0xc4] sm:$0xf] }
  0x3a   : > { %v1542_v15 = vld [vmem:[#allocation5 + $0xd0] sm:$0xf0]  ;;  %532 = vmatpush.bf16.msra.mxu1 %v1561_v7  ;;  %v1541_v16 = vor.u32 %v1732_v13, %v1540_v11  ;;  %v1548_v18 = vld [vmem:[#allocation5 + $0xc8] sm:$0xf]  ;;  %v1733_v19 = vld [vmem:[#allocation5 + $0xd4] sm:$0xf0] }
  0x3b   : > { %551 = vmatpush.bf16.msra.mxu2 %v1565_v8  ;;  %v1545_v17 = vor.u32 %v1730_v14, %v1542_v15  ;;  %v1731_v20 = vld [vmem:[#allocation5 + $0xcc] sm:$0xf]  ;;  %570 = vmatpush.bf16.msra.mxu3 %v1569_v12  ;;  %v1549_v21 = vor.u32 %v1733_v19, %v1548_v18  ;;  %v1550_v22 = vld [vmem:[#allocation5 + $0xd8] sm:$0xf0]  ;;  %v1524_v23 = vld [vmem:[#allocation5 + $0xa0] sm:$0xf] }
  0x3c   : > { %v1728_v24 = vld [vmem:[#allocation5 + $0xac] sm:$0xf0]  ;;  %v1553_v25 = vor.u32 %v1731_v20, %v1550_v22  ;;  %v1726_v26 = vld [vmem:[#allocation5 + $0xa4] sm:$0xf]  ;;  %v1526_v27 = vld [vmem:[#allocation5 + $0xb0] sm:$0xf0] }
  0x3d   : > { %v1532_v28 = vld [vmem:[#allocation5 + $0xa8] sm:$0xf]  ;;  %514 = vmatpush.bf16.msra.mxu0 %v1541_v16  ;;  %v1525_v29 = vor.u32 %v1728_v24, %v1524_v23  ;;  %v1729_v30 = vld [vmem:[#allocation5 + $0xb4] sm:$0xf0]  ;;  %v1727_v31 = vld [vmem:[#allocation5 + $0xac] sm:$0xf]  ;;  %v1529_v33 = vor.u32 %v1726_v26, %v1526_v27 }
  0x3e   : > { %v1534_v32 = vld [vmem:[#allocation5 + $0xb8] sm:$0xf0]  ;;  %533 = vmatpush.bf16.msra.mxu1 %v1545_v17  ;;  %v1533_v34 = vor.u32 %v1729_v30, %v1532_v28  ;;  %v1508_v35 = vld [vmem:[#allocation5 + $0x80] sm:$0xf]  ;;  %v1724_v36 = vld [vmem:[#allocation5 + $0x8c] sm:$0xf0] }
  0x3f   : > { %552 = vmatpush.bf16.msra.mxu2 %v1549_v21  ;;  %v1722_v37 = vld [vmem:[#allocation5 + $0x84] sm:$0xf]  ;;  %571 = vmatpush.bf16.msra.mxu3 %v1553_v25  ;;  %v1537_v38 = vor.u32 %v1727_v31, %v1534_v32  ;;  %v1510_v39 = vld [vmem:[#allocation5 + $0x90] sm:$0xf0]  ;;  %v1516_v40 = vld [vmem:[#allocation5 + $0x88] sm:$0xf]  ;;  %v1509_v44 = vor.u32 %v1724_v36, %v1508_v35 }
  0x40   : > { %v1725_v41 = vld [vmem:[#allocation5 + $0x94] sm:$0xf0]  ;;  %v1723_v42 = vld [vmem:[#allocation5 + $0x8c] sm:$0xf]  ;;  %v1518_v43 = vld [vmem:[#allocation5 + $0x98] sm:$0xf0]  ;;  %v1513_v45 = vor.u32 %v1722_v37, %v1510_v39 }
  0x41   : > { %515 = vmatpush.bf16.msra.mxu0 %v1525_v29  ;;  %v1517_v46 = vor.u32 %v1725_v41, %v1516_v40  ;;  %v1492_v47 = vld [vmem:[#allocation5 + $0x60] sm:$0xf]  ;;  %v1720_v48 = vld [vmem:[#allocation5 + $0x6c] sm:$0xf0]  ;;  %v1718_v49 = vld [vmem:[#allocation5 + $0x64] sm:$0xf]  ;;  %v1521_v50 = vor.u32 %v1723_v42, %v1518_v43 }
  0x42   : > { %534 = vmatpush.bf16.msra.mxu1 %v1529_v33  ;;  %v1494_v51 = vld [vmem:[#allocation5 + $0x70] sm:$0xf0]  ;;  %v1500_v52 = vld [vmem:[#allocation5 + $0x68] sm:$0xf]  ;;  %v1721_v53 = vld [vmem:[#allocation5 + $0x74] sm:$0xf0]  ;;  %v1493_v56 = vor.u32 %v1720_v48, %v1492_v47 }
  0x43   : > { %553 = vmatpush.bf16.msra.mxu2 %v1533_v34  ;;  %572 = vmatpush.bf16.msra.mxu3 %v1537_v38  ;;  %v1719_v54 = vld [vmem:[#allocation5 + $0x6c] sm:$0xf]  ;;  %v1502_v55 = vld [vmem:[#allocation5 + $0x78] sm:$0xf0]  ;;  %v1497_v57 = vor.u32 %v1718_v49, %v1494_v51  ;;  %v1501_v58 = vor.u32 %v1721_v53, %v1500_v52  ;;  %v1476_v59 = vld [vmem:[#allocation5 + $0x40] sm:$0xf] }
  0x44   : > { %v1716_v60 = vld [vmem:[#allocation5 + $0x4c] sm:$0xf0]  ;;  %v1714_v61 = vld [vmem:[#allocation5 + $0x44] sm:$0xf]  ;;  %v1505_v62 = vor.u32 %v1719_v54, %v1502_v55  ;;  %v1478_v63 = vld [vmem:[#allocation5 + $0x50] sm:$0xf0] }
  0x45   : > { %516 = vmatpush.bf16.msra.mxu0 %v1509_v44  ;;  %v1484_v0 = vld [vmem:[#allocation5 + $0x48] sm:$0xf]  ;;  %v1717_v1 = vld [vmem:[#allocation5 + $0x54] sm:$0xf0]  ;;  %v1715_v2 = vld [vmem:[#allocation5 + $0x4c] sm:$0xf]  ;;  %v1477_v4 = vor.u32 %v1716_v60, %v1476_v59  ;;  %v1481_v5 = vor.u32 %v1714_v61, %v1478_v63 }
  0x46   : > { %535 = vmatpush.bf16.msra.mxu1 %v1513_v45  ;;  %v1486_v3 = vld [vmem:[#allocation5 + $0x58] sm:$0xf0]  ;;  %v1485_v6 = vor.u32 %v1717_v1, %v1484_v0  ;;  %v1460_v7 = vld [vmem:[#allocation5 + $0x20] sm:$0xf]  ;;  %v1712_v8 = vld [vmem:[#allocation5 + $0x2c] sm:$0xf0] }
  0x47   : > { %554 = vmatpush.bf16.msra.mxu2 %v1517_v46  ;;  %573 = vmatpush.bf16.msra.mxu3 %v1521_v50  ;;  %v1710_v9 = vld [vmem:[#allocation5 + $0x24] sm:$0xf]  ;;  %v1489_v10 = vor.u32 %v1715_v2, %v1486_v3  ;;  %v1462_v11 = vld [vmem:[#allocation5 + $0x30] sm:$0xf0]  ;;  %v1468_v12 = vld [vmem:[#allocation5 + $0x28] sm:$0xf]  ;;  %v1461_v16 = vor.u32 %v1712_v8, %v1460_v7 }
  0x48   : > { %v1713_v13 = vld [vmem:[#allocation5 + $0x34] sm:$0xf0]  ;;  %v1711_v14 = vld [vmem:[#allocation5 + $0x2c] sm:$0xf]  ;;  %v1470_v15 = vld [vmem:[#allocation5 + $0x38] sm:$0xf0]  ;;  %v1465_v17 = vor.u32 %v1710_v9, %v1462_v11 }
  0x49   : > { %517 = vmatpush.bf16.msra.mxu0 %v1493_v56  ;;  %v1469_v18 = vor.u32 %v1713_v13, %v1468_v12  ;;  %v1444_v19 = vld [vmem:[#allocation5] sm:$0xf]  ;;  %v1708_v20 = vld [vmem:[#allocation5 + $0xc] sm:$0xf0]  ;;  %v1706_v21 = vld [vmem:[#allocation5 + $0x4] sm:$0xf]  ;;  %v1473_v22 = vor.u32 %v1711_v14, %v1470_v15 }
  0x4a   : > { %536 = vmatpush.bf16.msra.mxu1 %v1497_v57  ;;  %v1446_v23 = vld [vmem:[#allocation5 + $0x10] sm:$0xf0]  ;;  %v1452_v24 = vld [vmem:[#allocation5 + $0x8] sm:$0xf]  ;;  %v1709_v25 = vld [vmem:[#allocation5 + $0x14] sm:$0xf0]  ;;  %v1445_v28 = vor.u32 %v1708_v20, %v1444_v19 }
  0x4b   : > { %555 = vmatpush.bf16.msra.mxu2 %v1501_v58  ;;  %574 = vmatpush.bf16.msra.mxu3 %v1505_v62  ;;  %v1707_v26 = vld [vmem:[#allocation5 + $0xc] sm:$0xf]  ;;  %v1454_v27 = vld [vmem:[#allocation5 + $0x18] sm:$0xf0]  ;;  %v1449_v29 = vor.u32 %v1706_v21, %v1446_v23  ;;  %v1453_v30 = vor.u32 %v1709_v25, %v1452_v24  ;;  %v1704_v32 = vld [vmem:[%s2254_s11] sm:$0xff]  ;;  %s292_s28 = scalar_lea.vmem [#allocation10], %s1429_s27 }
  0x4c   : > { %v1457_v31 = vor.u32 %v1707_v26, %v1454_v27  ;;  %v1705_v33 = vld [vmem:[%s2254_s11 + $0x8] sm:$0xff]  ;;  %v331_v34 = vld [vmem:[#allocation7] sm:$0xf]  ;;  %s1770_s16 = sshll.u32 %s2154_s22, 4  ;;  %s1314_s13 = sshll.u32 %s292_s28, 4  ;;  %s1315_s13 = int_to_ptr.vmem [resolvable:$true] %s1314_s13 }
  0x4d   : > { %518 = vmatpush.bf16.msra.mxu0 %v1477_v4  ;;  %v2270_v35 = vperm.slane %v331_v34, 0  ;;  %v2272_v36 = vperm.slane %v331_v34, 1  ;;  %v2276_v42 = vperm.slane %v331_v34, 2  ;;  %v2278_v43 = vperm.slane %v331_v34, 3  ;;  %v1745_v20 = vld [vmem:[#allocation8 + $0x38] sm:$0xff]  ;;  %s1313_s6 = scalar_lea.hbm %s2505_s5, %s1770_s16  ;;  %s1302_s22 = scalar_lea.sflag [#allocation4], %s2248_s17 }
  0x4e   : > { %537 = vmatpush.bf16.msra.mxu1 %v1481_v5  ;;  %v1753_v21 = vld [vmem:[#allocation8 + $0x78] sm:$0xff]  ;;  %s1316_s12 = sshll.u32 %s1313_s6, 4  ;;  %s2038_s8 = scalar_lea.hbm %s2505_s5, 32  ;;  %s1317_s12 = int_to_ptr.hbm [resolvable:$true] %s1316_s12 }
  0x4f   : > { %556 = vmatpush.bf16.msra.mxu2 %v1485_v6  ;;  %575 = vmatpush.bf16.msra.mxu3 %v1489_v10  ;;  %s2032_s14 = sshra.s32 %s1317_s12, 4  ;;  %s2033_s14 = int_to_ptr.hbm [resolvable:$true] %s2032_s14 }
  0x50   : > { %s2034_s15 = scalar_lea.hbm %s2033_s14, 16  ;;  %p2039_p11 = scmp.lt.s32.totalorder %s2033_s14, %s2505_s5 }
  0x51   : > { %519 = vmatpush.bf16.msra.mxu0 %v1461_v16  ;;  %p2035_p1 = scmp.ne.s32.totalorder %s2033_s14, %s2034_s15  ;;  %p2040_p9 = scmp.lt.s32.totalorder %s2038_s8, %s2034_s15 }
  0x52   : > { %538 = vmatpush.bf16.msra.mxu1 %v1465_v17 }
  0x53   : > { %557 = vmatpush.bf16.msra.mxu2 %v1469_v18  ;;  %576 = vmatpush.bf16.msra.mxu3 %v1473_v22  ;;  %p2036_p4 = pnand %p2035_p1, %p2218_p3  ;;  %p2041_p2 = por %p2040_p9, %p2039_p11 }
  0x55   : > { %520 = vmatpush.bf16.msra.mxu0 %v1445_v28  ;;  %p2037_p8 = pneg %p2036_p4 }
  0x56   : > { %539 = vmatpush.bf16.msra.mxu1 %v1449_v29 }
  0x57   : > { %558 = vmatpush.bf16.msra.mxu2 %v1453_v30  ;;  %577 = vmatpush.bf16.msra.mxu3 %v1457_v31  ;;  %p2042_p10 = pnand %p2041_p2, %p2037_p8 }
  0x58   : > { %521 = vmatmul.bf16.vlgmr.msra.gmra.mxu0 %v1704_v32 }
  0x59   : > { %540 = vmatmul.bf16.vlgmr.msra.gmra.mxu1 %v1704_v32  ;;  %1217 = vmatpush.bf16.msrb.mxu0 %v1745_v20 }
  0x5a   : > { %559 = vmatmul.bf16.vlgmr.msra.gmra.mxu2 %v1704_v32  ;;  %578 = vmatmul.bf16.vlgmr.msra.gmra.mxu3 %v1704_v32 }
  0x5b   : > { %1236 = vmatpush.bf16.msrb.mxu1 %v1753_v21 }
  0x68   : > { %526 = vmatmul.bf16.gmra.mxu0 %v1705_v33 }
  0x69   : > { %545 = vmatmul.bf16.gmra.mxu1 %v1705_v33 }
  0x6a   : > { %564 = vmatmul.bf16.gmra.mxu2 %v1705_v33  ;;  %583 = vmatmul.bf16.gmra.mxu3 %v1705_v33 }
  0xd5   : > { %v522_v37 = vpop.f32.mrf.mxu0 }
  0xd6   : > { %v523_v38 = vadd.f32 %v522_v37, %v2270_v35  ;;  %v541_v39 = vpop.f32.mrf.mxu1 }
  0xd7   : > { %v542_v40 = vadd.f32 %v541_v39, %v2272_v36  ;;  %v1744_v39 = vld [vmem:[#allocation8 + $0x30] sm:$0xff] }
  0xd8   : > { %1218 = vmatpush.bf16.msrb.mxu0 %v1744_v39 }
  0xd9   : > { %v589_v41 = vpack.c.bf16 %v542_v40, %v523_v38  ;;  %v1752_v40 = vld [vmem:[#allocation8 + $0x70] sm:$0xff] }
  0xda   : > { %1237 = vmatpush.bf16.msrb.mxu1 %v1752_v40 }
  0xdb   : > { %v2280_v44 = vunpack.c.l.bf16 %v589_v41  ;;  %v2282_v45 = vunpack.c.h.bf16 %v589_v41 }
  0xdd   : > { %v560_v46 = vpop.f32.mrf.mxu2  ;;  %v637_v47 = vmul.f32 0.044677734, %v2280_v44  ;;  %v638_v48 = vmul.f32 0.044677734, %v2282_v45  ;;  %v579_v50 = vpop.f32.mrf.mxu3  ;;  %v614_v39 = vmul.f32 0.5, %v2282_v45 }
  0xde   : > { %v561_v49 = vadd.f32 %v560_v46, %v2276_v42  ;;  %v524_v51 = vpop.f32.mrf.mxu0  ;;  %v580_v52 = vadd.f32 %v579_v50, %v2278_v43  ;;  %v543_v54 = vpop.f32.mrf.mxu1 }
  0xdf   : > { %v525_v53 = vadd.f32 %v524_v51, %v2270_v35  ;;  %v653_v55 = vpack.c.bf16 %v638_v48, %v637_v47  ;;  %v544_v56 = vadd.f32 %v543_v54, %v2272_v36 }
  0xe0   : > { %v590_v57 = vpack.c.bf16 %v580_v52, %v561_v49  ;;  %v1761_v52 = vld [vmem:[#allocation8 + $0xb8] sm:$0xff] }
  0xe1   : > { %v661_v58 = vunpack.c.l.bf16 %v653_v55  ;;  %v662_v59 = vunpack.c.h.bf16 %v653_v55  ;;  %v591_v60 = vpack.c.bf16 %v544_v56, %v525_v53  ;;  %v1769_v53 = vld [vmem:[#allocation8 + $0xf8] sm:$0xff]  ;;  %1255 = vmatpush.bf16.msrb.mxu2 %v1761_v52 }
  0xe2   : > { %v2290_v61 = vunpack.c.l.bf16 %v590_v57  ;;  %v2292_v62 = vunpack.c.h.bf16 %v590_v57  ;;  %1274 = vmatpush.bf16.msrb.mxu3 %v1769_v53  ;;  %v1741_v52 = vld [vmem:[#allocation8 + $0x18] sm:$0xff] }
  0xe3   : > { %v677_v63 = vmul.f32 %v661_v58, %v2280_v44  ;;  %v678_v0 = vmul.f32 %v662_v59, %v2282_v45  ;;  %v2296_v1 = vunpack.c.l.bf16 %v591_v60  ;;  %v2298_v2 = vunpack.c.h.bf16 %v591_v60  ;;  %v1749_v53 = vld [vmem:[#allocation8 + $0x58] sm:$0xff] }
  0xe4   : > { %v639_v3 = vmul.f32 0.044677734, %v2290_v61  ;;  %v640_v4 = vmul.f32 0.044677734, %v2292_v62 }
  0xe5   : > { %v562_v5 = vpop.f32.mrf.mxu2  ;;  %v693_v6 = vpack.c.bf16 %v678_v0, %v677_v63  ;;  %v641_v7 = vmul.f32 0.044677734, %v2296_v1  ;;  %v642_v8 = vmul.f32 0.044677734, %v2298_v2  ;;  %v581_v10 = vpop.f32.mrf.mxu3  ;;  %v1743_v0 = vld [vmem:[#allocation8 + $0x28] sm:$0xff] }
  0xe6   : > { %v563_v9 = vadd.f32 %v562_v5, %v2276_v42  ;;  %v527_v11 = vpop.f32.mrf.mxu0  ;;  %v654_v12 = vpack.c.bf16 %v640_v4, %v639_v3  ;;  %v582_v13 = vadd.f32 %v581_v10, %v2278_v43  ;;  %v546_v15 = vpop.f32.mrf.mxu1  ;;  %v1751_v3 = vld [vmem:[#allocation8 + $0x68] sm:$0xff]  ;;  %1219 = vmatpush.bf16.msrb.mxu0 %v1743_v0 }
  0xe7   : > { %v528_v14 = vadd.f32 %v527_v11, %v2270_v35  ;;  %v701_v16 = vunpack.c.l.bf16 %v693_v6  ;;  %v702_v17 = vunpack.c.h.bf16 %v693_v6  ;;  %v655_v18 = vpack.c.bf16 %v642_v8, %v641_v7  ;;  %1238 = vmatpush.bf16.msrb.mxu1 %v1751_v3 }
  0xe8   : > { %v547_v19 = vadd.f32 %v546_v15, %v2272_v36  ;;  %v663_v22 = vunpack.c.l.bf16 %v654_v12  ;;  %v664_v23 = vunpack.c.h.bf16 %v654_v12  ;;  %v592_v24 = vpack.c.bf16 %v582_v13, %v563_v9  ;;  %v1760_v12 = vld [vmem:[#allocation8 + $0xb0] sm:$0xff] }
  0xe9   : > { %v717_v25 = vmul.f32 %v701_v16, %v2280_v44  ;;  %v718_v26 = vmul.f32 %v702_v17, %v2282_v45  ;;  %v665_v27 = vunpack.c.l.bf16 %v655_v18  ;;  %v666_v28 = vunpack.c.h.bf16 %v655_v18  ;;  %v1768_v13 = vld [vmem:[#allocation8 + $0xf0] sm:$0xff]  ;;  %1256 = vmatpush.bf16.msrb.mxu2 %v1760_v12 }
  0xea   : > { %v679_v29 = vmul.f32 %v663_v22, %v2290_v61  ;;  %v680_v30 = vmul.f32 %v664_v23, %v2292_v62  ;;  %v2312_v31 = vunpack.c.l.bf16 %v592_v24  ;;  %v2314_v32 = vunpack.c.h.bf16 %v592_v24  ;;  %1275 = vmatpush.bf16.msrb.mxu3 %v1768_v13  ;;  %v1742_v22 = vld [vmem:[#allocation8 + $0x20] sm:$0xff]  ;;  %v1740_v13 = vld [vmem:[#allocation8 + $0x10] sm:$0xff] }
  0xeb   : > { %v733_v33 = vpack.c.bf16 %v718_v26, %v717_v25  ;;  %v681_v34 = vmul.f32 %v665_v27, %v2296_v1  ;;  %v682_v37 = vmul.f32 %v666_v28, %v2298_v2  ;;  %v593_v38 = vpack.c.bf16 %v547_v19, %v528_v14  ;;  %v1750_v23 = vld [vmem:[#allocation8 + $0x60] sm:$0xff]  ;;  %1220 = vmatpush.bf16.msrb.mxu0 %v1742_v22 }
  0xec   : > { %v694_v41 = vpack.c.bf16 %v680_v30, %v679_v29  ;;  %v643_v46 = vmul.f32 0.044677734, %v2312_v31  ;;  %v644_v47 = vmul.f32 0.044677734, %v2314_v32  ;;  %v613_v24 = vmul.f32 0.5, %v2280_v44  ;;  %1239 = vmatpush.bf16.msrb.mxu1 %v1750_v23 }
  0xed   : > { %v741_v48 = vunpack.c.l.bf16 %v733_v33  ;;  %v742_v49 = vunpack.c.h.bf16 %v733_v33  ;;  %v695_v50 = vpack.c.bf16 %v682_v37, %v681_v34  ;;  %v2320_v51 = vunpack.c.l.bf16 %v593_v38  ;;  %v565_v18 = vpop.f32.mrf.mxu2  ;;  %v584_v29 = vpop.f32.mrf.mxu3  ;;  %v1759_v37 = vld [vmem:[#allocation8 + $0xa8] sm:$0xff] }
  0xee   : > { %v703_v54 = vunpack.c.l.bf16 %v694_v41  ;;  %v704_v55 = vunpack.c.h.bf16 %v694_v41  ;;  %v656_v56 = vpack.c.bf16 %v644_v47, %v643_v46  ;;  %v2322_v57 = vunpack.c.h.bf16 %v593_v38  ;;  %v1767_v38 = vld [vmem:[#allocation8 + $0xe8] sm:$0xff]  ;;  %1257 = vmatpush.bf16.msrb.mxu2 %v1759_v37  ;;  %v529_v0 = vpop.f32.mrf.mxu0  ;;  %v548_v3 = vpop.f32.mrf.mxu1 }
  0xef   : > { %v757_v58 = vadd.f32 %v741_v48, %v2280_v44  ;;  %v758_v59 = vadd.f32 %v742_v49, %v2282_v45  ;;  %v705_v60 = vunpack.c.l.bf16 %v695_v50  ;;  %v706_v63 = vunpack.c.h.bf16 %v695_v50  ;;  %1276 = vmatpush.bf16.msrb.mxu3 %v1767_v38  ;;  %1221 = vmatpush.bf16.msrb.mxu0 %v1741_v52  ;;  %v1747_v37 = vld [vmem:[#allocation8 + $0x48] sm:$0xff] }
  0xf0   : > { %v719_v4 = vmul.f32 %v703_v54, %v2290_v61  ;;  %v720_v5 = vmul.f32 %v704_v55, %v2292_v62  ;;  %v667_v6 = vunpack.c.l.bf16 %v656_v56  ;;  %v668_v7 = vunpack.c.h.bf16 %v656_v56  ;;  %1240 = vmatpush.bf16.msrb.mxu1 %v1749_v53 }
  0xf1   : > { %v773_v8 = vpack.c.bf16 %v758_v59, %v757_v58  ;;  %v721_v9 = vmul.f32 %v705_v60, %v2296_v1  ;;  %v722_v10 = vmul.f32 %v706_v63, %v2298_v2  ;;  %v645_v11 = vmul.f32 0.044677734, %v2320_v51 }
  0xf2   : > { %v734_v14 = vpack.c.bf16 %v720_v5, %v719_v4  ;;  %v683_v15 = vmul.f32 %v667_v6, %v2312_v31  ;;  %v684_v16 = vmul.f32 %v668_v7, %v2314_v32  ;;  %v646_v17 = vmul.f32 0.044677734, %v2322_v57  ;;  %v1758_v4 = vld [vmem:[#allocation8 + $0xa0] sm:$0xff] }
  0xf3   : > { %v781_v19 = vunpack.c.l.bf16 %v773_v8  ;;  %v782_v20 = vunpack.c.h.bf16 %v773_v8  ;;  %v735_v21 = vpack.c.bf16 %v722_v10, %v721_v9  ;;  %v566_v34 = vadd.f32 %v565_v18, %v2276_v42  ;;  %v1766_v5 = vld [vmem:[#allocation8 + $0xe0] sm:$0xff]  ;;  %1258 = vmatpush.bf16.msrb.mxu2 %v1758_v4  ;;  %1222 = vmatpush.bf16.msrb.mxu0 %v1740_v13 }
  0xf4   : > { %v743_v25 = vunpack.c.l.bf16 %v734_v14  ;;  %v744_v26 = vunpack.c.h.bf16 %v734_v14  ;;  %v696_v27 = vpack.c.bf16 %v684_v16, %v683_v15  ;;  %v657_v28 = vpack.c.bf16 %v646_v17, %v645_v11  ;;  %1277 = vmatpush.bf16.msrb.mxu3 %v1766_v5  ;;  %v1748_v14 = vld [vmem:[#allocation8 + $0x50] sm:$0xff] }
  0xf5   : > { %v745_v30 = vunpack.c.l.bf16 %v735_v21  ;;  %v746_v33 = vunpack.c.h.bf16 %v735_v21  ;;  %v797_v47 = vmul.f32 0.796875, %v781_v19  ;;  %v798_v54 = vmul.f32 0.796875, %v782_v20  ;;  %v567_v23 = vpop.f32.mrf.mxu2  ;;  %1241 = vmatpush.bf16.msrb.mxu1 %v1748_v14 }
  0xf6   : > { %v759_v40 = vadd.f32 %v743_v25, %v2290_v61  ;;  %v760_v41 = vadd.f32 %v744_v26, %v2292_v62  ;;  %v707_v44 = vunpack.c.l.bf16 %v696_v27  ;;  %v708_v46 = vunpack.c.h.bf16 %v696_v27  ;;  %v1765_v25 = vld [vmem:[#allocation8 + $0xd8] sm:$0xff] }
  0xf7   : > { %v761_v48 = vadd.f32 %v745_v30, %v2296_v1  ;;  %v762_v49 = vadd.f32 %v746_v33, %v2298_v2  ;;  %v669_v50 = vunpack.c.l.bf16 %v657_v28  ;;  %v670_v56 = vunpack.c.h.bf16 %v657_v28 }
  0xf8   : > { %v723_v55 = vmul.f32 %v707_v44, %v2312_v31  ;;  %v724_v45 = vmul.f32 %v708_v46, %v2314_v32  ;;  %v2343_v58 = vpack.c.bf16 %v760_v41, %v759_v40  ;;  %v585_v63 = vadd.f32 %v584_v29, %v2278_v43  ;;  %1278 = vmatpush.bf16.msrb.mxu3 %v1765_v25 }
  0xf9   : > { %v775_v59 = vpack.c.bf16 %v762_v49, %v761_v48  ;;  %v685_v60 = vmul.f32 %v669_v50, %v2320_v51  ;;  %v686_v7 = vmul.f32 %v670_v56, %v2322_v57  ;;  %v617_v8 = vmul.f32 0.5, %v2296_v1  ;;  %v1756_v48 = vld [vmem:[#allocation8 + $0x90] sm:$0xff]  ;;  %1242 = vmatpush.bf16.msrb.mxu1 %v1747_v37 }
  0xfa   : > { %v736_v6 = vpack.c.bf16 %v724_v45, %v723_v55  ;;  %v2349_v9 = vpack.c.bf16 %v614_v39, %v613_v24  ;;  %v594_v12 = vpack.c.bf16 %v585_v63, %v566_v34  ;;  %v618_v15 = vmul.f32 0.5, %v2298_v2  ;;  %v1757_v24 = vld [vmem:[#allocation8 + $0x98] sm:$0xff]  ;;  %v1739_v34 = vld [vmem:[#allocation8 + $0x8] sm:$0xff]  ;;  %v1764_v49 = vld [vmem:[#allocation8 + $0xd0] sm:$0xff] }
  0xfb   : > { %v785_v10 = vunpack.c.l.bf16 %v775_v59  ;;  %v786_v11 = vunpack.c.h.bf16 %v775_v59  ;;  %v530_v18 = vadd.f32 %v529_v0, %v2270_v35  ;;  %v549_v19 = vadd.f32 %v548_v3, %v2272_v36  ;;  %v586_v35 = vpop.f32.mrf.mxu3  ;;  %1259 = vmatpush.bf16.msrb.mxu2 %v1757_v24  ;;  %1223 = vmatpush.bf16.msrb.mxu0 %v1739_v34  ;;  %v1746_v45 = vld [vmem:[#allocation8 + $0x40] sm:$0xff]  ;;  %v1755_v63 = vld [vmem:[#allocation8 + $0x88] sm:$0xff] }
  0xfc   : > { %v747_v16 = vunpack.c.l.bf16 %v736_v6  ;;  %v748_v17 = vunpack.c.h.bf16 %v736_v6  ;;  %v2354_v20 = vpack.c.bf16 %v798_v54, %v797_v47  ;;  %v783_v1 = vunpack.c.l.bf16 %v2343_v58  ;;  %1279 = vmatpush.bf16.msrb.mxu3 %v1764_v49  ;;  %v1763_v0 = vld [vmem:[#allocation8 + $0xc8] sm:$0xff] }
  0xfd   : > { %v697_v21 = vpack.c.bf16 %v686_v7, %v685_v60  ;;  %v2357_v22 = vunpack.c.l.bf16 %v594_v12  ;;  %v801_v26 = vmul.f32 0.796875, %v785_v10  ;;  %v2361_v28 = vunpack.c.h.bf16 %v594_v12  ;;  %1243 = vmatpush.bf16.msrb.mxu1 %v1746_v45 }
  0xfe   : > { %v763_v2 = vadd.f32 %v747_v16, %v2312_v31  ;;  %v764_v27 = vadd.f32 %v748_v17, %v2314_v32  ;;  %v802_v36 = vmul.f32 0.796875, %v786_v11  ;;  %v595_v40 = vpack.c.bf16 %v549_v19, %v530_v18  ;;  %v1754_v19 = vld [vmem:[#allocation8 + $0x80] sm:$0xff] }
  0xff   : > { %v709_v29 = vunpack.c.l.bf16 %v697_v21  ;;  %v710_v30 = vunpack.c.h.bf16 %v697_v21  ;;  %v647_v33 = vmul.f32 0.044677734, %v2357_v22  ;;  %v648_v39 = vmul.f32 0.044677734, %v2361_v28  ;;  %1260 = vmatpush.bf16.msrb.mxu2 %v1756_v48 }
 0x100   : > { %v2364_v38 = vpack.c.bf16 %v764_v27, %v763_v2  ;;  %v568_v41 = vadd.f32 %v567_v23, %v2276_v42  ;;  %v587_v47 = vadd.f32 %v586_v35, %v2278_v43  ;;  %v2371_v50 = vpack.c.bf16 %v618_v15, %v617_v8  ;;  %v1738_v42 = vld [vmem:[#allocation8] sm:$0xff]  ;;  %1280 = vmatpush.bf16.msrb.mxu3 %v1763_v0 }
 0x101   : > { %v725_v44 = vmul.f32 %v709_v29, %v2320_v51  ;;  %v726_v46 = vmul.f32 %v710_v30, %v2322_v57  ;;  %v784_v52 = vunpack.c.h.bf16 %v2343_v58  ;;  %v2374_v53 = vmul.f32 0.796875, %v783_v1  ;;  %1224 = vmatpush.bf16.msrb.mxu0 %v1738_v42  ;;  %v1762_v1 = vld [vmem:[#allocation8 + $0xc0] sm:$0xff] }
 0x102   : > { %v658_v54 = vpack.c.bf16 %v648_v39, %v647_v33  ;;  %v2376_v55 = vunpack.c.l.bf16 %v595_v40  ;;  %v815_v56 = vpack.c.bf16 %v802_v36, %v801_v26  ;;  %v2378_v60 = vunpack.c.h.bf16 %v595_v40 }
 0x103   : > { %v737_v59 = vpack.c.bf16 %v726_v46, %v725_v44  ;;  %v596_v43 = vpack.c.bf16 %v587_v47, %v568_v41  ;;  %v787_v3 = vunpack.c.l.bf16 %v2364_v38  ;;  %v821_v5 = vunpack.c.l.bf16 %v2354_v20  ;;  %1261 = vmatpush.bf16.msrb.mxu2 %v1755_v63 }
 0x104   : > { %v671_v58 = vunpack.c.l.bf16 %v658_v54  ;;  %v672_v4 = vunpack.c.h.bf16 %v658_v54  ;;  %v649_v8 = vmul.f32 0.044677734, %v2376_v55  ;;  %v650_v10 = vmul.f32 0.044677734, %v2378_v60  ;;  %1281 = vmatpush.bf16.msrb.mxu3 %v1762_v1 }
 0x105   : > { %v749_v6 = vunpack.c.l.bf16 %v737_v59  ;;  %v750_v7 = vunpack.c.h.bf16 %v737_v59  ;;  %v788_v11 = vunpack.c.h.bf16 %v2364_v38  ;;  %v2387_v14 = vunpack.c.l.bf16 %v596_v43 }
 0x106   : > { %v687_v12 = vmul.f32 %v671_v58, %v2357_v22  ;;  %v688_v13 = vmul.f32 %v672_v4, %v2361_v28  ;;  %v659_v17 = vpack.c.bf16 %v650_v10, %v649_v8  ;;  %v2391_v18 = vunpack.c.h.bf16 %v596_v43 }
 0x107   : > { %v765_v15 = vadd.f32 %v749_v6, %v2320_v51  ;;  %v766_v16 = vadd.f32 %v750_v7, %v2322_v57  ;;  %v651_v23 = vmul.f32 0.044677734, %v2387_v14  ;;  %v822_v24 = vunpack.c.h.bf16 %v2354_v20  ;;  %1262 = vmatpush.bf16.msrb.mxu2 %v1754_v19 }
 0x108   : > { %v698_v21 = vpack.c.bf16 %v688_v13, %v687_v12  ;;  %v825_v25 = vunpack.c.l.bf16 %v815_v56  ;;  %v673_v2 = vunpack.c.l.bf16 %v659_v17  ;;  %v674_v27 = vunpack.c.h.bf16 %v659_v17 }
 0x109   : > { %v777_v26 = vpack.c.bf16 %v766_v16, %v765_v15  ;;  %v652_v35 = vmul.f32 0.044677734, %v2391_v18  ;;  %v826_v30 = vunpack.c.h.bf16 %v815_v56  ;;  %1866 = vtanh.f32 %v821_v5 }
 0x10a   : > { %v711_v36 = vunpack.c.l.bf16 %v698_v21  ;;  %v712_v29 = vunpack.c.h.bf16 %v698_v21  ;;  %v800_v33 = vmul.f32 0.796875, %v784_v52  ;;  %v803_v34 = vmul.f32 0.796875, %v787_v3 }
 0x10b   : > { %v689_v37 = vmul.f32 %v673_v2, %v2376_v55  ;;  %v690_v38 = vmul.f32 %v674_v27, %v2378_v60  ;;  %v660_v40 = vpack.c.bf16 %v652_v35, %v651_v23  ;;  %1868 = vtanh.f32 %v822_v24 }
 0x10c   : > { %v727_v20 = vmul.f32 %v711_v36, %v2357_v22  ;;  %v728_v39 = vmul.f32 %v712_v29, %v2361_v28  ;;  %v804_v41 = vmul.f32 0.796875, %v788_v11  ;;  %v789_v44 = vunpack.c.l.bf16 %v777_v26 }
 0x10d   : > { %v699_v46 = vpack.c.bf16 %v690_v38, %v689_v37  ;;  %1870 = vtanh.f32 %v825_v25  ;;  %v790_v47 = vunpack.c.h.bf16 %v777_v26  ;;  %v675_v48 = vunpack.c.l.bf16 %v660_v40 }
 0x10e   : > { %v676_v49 = vunpack.c.h.bf16 %v660_v40  ;;  %1872 = vtanh.f32 %v826_v30  ;;  %v738_v45 = vpack.c.bf16 %v728_v39, %v727_v20  ;;  %v901_v43 = vunpack.c.l.bf16 %v2349_v9 }
 0x10f   : > { %v713_v52 = vunpack.c.l.bf16 %v699_v46  ;;  %v714_v54 = vunpack.c.h.bf16 %v699_v46  ;;  %v1867_v42 = vpop.eup %1866  ;;  %v691_v56 = vmul.f32 %v675_v48, %v2387_v14  ;;  %v2404_v63 = vpack.c.bf16 %v800_v33, %v2374_v53 }
 0x110   : > { %v692_v59 = vmul.f32 %v676_v49, %v2391_v18  ;;  %v2406_v0 = vpack.c.bf16 %v804_v41, %v803_v34  ;;  %v2410_v5 = vmul.f32 0.796875, %v789_v44  ;;  %v2412_v6 = vmul.f32 0.796875, %v790_v47 }
 0x111   : > { %v729_v3 = vmul.f32 %v713_v52, %v2376_v55  ;;  %v730_v58 = vmul.f32 %v714_v54, %v2378_v60  ;;  %v1869_v4 = vpop.eup %1868  ;;  %v905_v8 = vunpack.c.l.bf16 %v2371_v50  ;;  %v902_v53 = vunpack.c.h.bf16 %v2349_v9 }
 0x112   : > { %v700_v7 = vpack.c.bf16 %v692_v59, %v691_v56  ;;  %v853_v12 = vpack.c.bf16 %v1869_v4, %v1867_v42  ;;  %v906_v13 = vunpack.c.h.bf16 %v2371_v50  ;;  %v751_v16 = vunpack.c.l.bf16 %v738_v45 }
 0x113   : > { %v1871_v10 = vpop.eup %1870  ;;  %v739_v11 = vpack.c.bf16 %v730_v58, %v729_v3  ;;  %v752_v17 = vunpack.c.h.bf16 %v738_v45  ;;  %v615_v27 = vmul.f32 0.5, %v2290_v61  ;;  %v616_v35 = vmul.f32 0.5, %v2292_v62 }
 0x114   : > { %v1873_v15 = vpop.eup %1872  ;;  %v715_v19 = vunpack.c.l.bf16 %v700_v7  ;;  %v716_v1 = vunpack.c.h.bf16 %v700_v7  ;;  %v861_v25 = vunpack.c.l.bf16 %v853_v12  ;;  %v862_v29 = vunpack.c.h.bf16 %v853_v12 }
 0x115   : > { %v753_v21 = vunpack.c.l.bf16 %v739_v11  ;;  %v754_v23 = vunpack.c.h.bf16 %v739_v11  ;;  %v855_v24 = vpack.c.bf16 %v1873_v15, %v1871_v10  ;;  %v767_v33 = vadd.f32 %v751_v16, %v2357_v22 }
 0x116   : > { %v731_v26 = vmul.f32 %v715_v19, %v2387_v14  ;;  %v732_v2 = vmul.f32 %v716_v1, %v2391_v18  ;;  %v768_v34 = vadd.f32 %v752_v17, %v2361_v28  ;;  %v877_v39 = vadd.f32 1.0, %v861_v25 }
 0x117   : > { %v769_v36 = vadd.f32 %v753_v21, %v2376_v55  ;;  %v770_v50 = vadd.f32 %v754_v23, %v2378_v60  ;;  %v865_v30 = vunpack.c.l.bf16 %v855_v24  ;;  %v866_v38 = vunpack.c.h.bf16 %v855_v24 }
 0x118   : > { %v740_v37 = vpack.c.bf16 %v732_v2, %v731_v26  ;;  %v878_v40 = vadd.f32 1.0, %v862_v29  ;;  %v619_v62 = vmul.f32 0.5, %v2312_v31  ;;  %v823_v52 = vunpack.c.l.bf16 %v2404_v63 }
 0x119   : > { %v779_v20 = vpack.c.bf16 %v770_v50, %v769_v36  ;;  %v881_v41 = vadd.f32 1.0, %v865_v30  ;;  %v882_v46 = vadd.f32 1.0, %v866_v38  ;;  %v620_v56 = vmul.f32 0.5, %v2314_v32 }
 0x11a   : > { %v755_v44 = vunpack.c.l.bf16 %v740_v37  ;;  %v756_v61 = vunpack.c.h.bf16 %v740_v37  ;;  %v893_v49 = vpack.c.bf16 %v878_v40, %v877_v39  ;;  %v778_v59 = vpack.c.bf16 %v768_v34, %v767_v33 }
 0x11b   : > { %v793_v47 = vunpack.c.l.bf16 %v779_v20  ;;  %v794_v48 = vunpack.c.h.bf16 %v779_v20  ;;  %v895_v45 = vpack.c.bf16 %v882_v46, %v881_v41  ;;  %v824_v4 = vunpack.c.h.bf16 %v2404_v63 }
 0x11c   : > { %v771_v54 = vadd.f32 %v755_v44, %v2387_v14  ;;  %v772_v42 = vadd.f32 %v756_v61, %v2391_v18  ;;  %v917_v3 = vunpack.c.l.bf16 %v893_v49  ;;  %v918_v58 = vunpack.c.h.bf16 %v893_v49 }
 0x11d   : > { %v921_v10 = vunpack.c.l.bf16 %v895_v45  ;;  %v922_v31 = vunpack.c.h.bf16 %v895_v45  ;;  %v827_v11 = vunpack.c.l.bf16 %v2406_v0  ;;  %v809_v12 = vmul.f32 0.796875, %v793_v47 }
 0x11e   : > { %v780_v7 = vpack.c.bf16 %v772_v42, %v771_v54  ;;  %v810_v15 = vmul.f32 0.796875, %v794_v48  ;;  %v828_v16 = vunpack.c.h.bf16 %v2406_v0  ;;  %1874 = vtanh.f32 %v823_v52 }
 0x11f   : > { %v933_v17 = vmul.f32 %v917_v3, %v901_v43  ;;  %v937_v19 = vmul.f32 %v921_v10, %v905_v8  ;;  %v934_v32 = vmul.f32 %v918_v58, %v902_v53  ;;  %v938_v1 = vmul.f32 %v922_v31, %v906_v13 }
 0x120   : > { %v791_v21 = vunpack.c.l.bf16 %v778_v59  ;;  %v792_v23 = vunpack.c.h.bf16 %v778_v59  ;;  %v795_v24 = vunpack.c.l.bf16 %v780_v7  ;;  %1876 = vtanh.f32 %v824_v4 }
 0x121   : > { %v796_v63 = vunpack.c.h.bf16 %v780_v7  ;;  %v949_v25 = vpack.c.bf16 %v937_v19, %v933_v17  ;;  %v950_v26 = vpack.c.bf16 %v938_v1, %v934_v32  ;;  %v2435_v2 = vpack.c.bf16 %v616_v35, %v615_v27 }
 0x122   : > { %v2437_v36 = vpack.c.bf16 %v620_v56, %v619_v62  ;;  %1878 = vtanh.f32 %v827_v11  ;;  %v817_v9 = vpack.c.bf16 %v2412_v6, %v2410_v5  ;;  %v819_v43 = vpack.c.bf16 %v810_v15, %v809_v12 }
 0x123   : > { %1225 = vmatmul.bf16.vlgmr.msrb.gmra.mxu0 %v949_v25  ;;  %1244 = vmatmul.bf16.vlgmr.msrb.gmra.mxu1 %v950_v26  ;;  %1880 = vtanh.f32 %v828_v16  ;;  %v807_v8 = vmul.f32 0.796875, %v791_v21  ;;  %v808_v53 = vmul.f32 0.796875, %v792_v23  ;;  %v811_v13 = vmul.f32 0.796875, %v795_v24 }
 0x124   : > { %v1875_v0 = vpop.eup %1874  ;;  %v812_v50 = vmul.f32 0.796875, %v796_v63  ;;  %v829_v29 = vunpack.c.l.bf16 %v817_v9  ;;  %v830_v30 = vunpack.c.h.bf16 %v817_v9  ;;  %v833_v33 = vunpack.c.l.bf16 %v819_v43 }
 0x125   : > { %v903_v35 = vunpack.c.l.bf16 %v2435_v2  ;;  %v907_v34 = vunpack.c.l.bf16 %v2437_v36  ;;  %v904_v37 = vunpack.c.h.bf16 %v2435_v2  ;;  %v834_v38 = vunpack.c.h.bf16 %v819_v43 }
 0x126   : > { %v1877_v27 = vpop.eup %1876  ;;  %v621_v5 = vmul.f32 0.5, %v2320_v51  ;;  %v622_v6 = vmul.f32 0.5, %v2322_v57  ;;  %1882 = vtanh.f32 %v829_v29  ;;  %v625_v40 = vmul.f32 0.5, %v2376_v55 }
 0x127   : > { %v854_v20 = vpack.c.bf16 %v1877_v27, %v1875_v0  ;;  %v626_v41 = vmul.f32 0.5, %v2378_v60  ;;  %1884 = vtanh.f32 %v830_v30  ;;  %v818_v44 = vpack.c.bf16 %v808_v53, %v807_v8 }
 0x128   : > { %v1879_v39 = vpop.eup %1878  ;;  %1886 = vtanh.f32 %v833_v33  ;;  %v820_v47 = vpack.c.bf16 %v812_v50, %v811_v13  ;;  %v2448_v55 = vpack.c.bf16 %v622_v6, %v621_v5  ;;  %v908_v3 = vunpack.c.h.bf16 %v2437_v36 }
 0x129   : > { %v1881_v61 = vpop.eup %1880  ;;  %v863_v46 = vunpack.c.l.bf16 %v854_v20  ;;  %v864_v62 = vunpack.c.h.bf16 %v854_v20  ;;  %1888 = vtanh.f32 %v834_v38  ;;  %v831_v49 = vunpack.c.l.bf16 %v818_v44 }
 0x12a   : > { %v856_v48 = vpack.c.bf16 %v1881_v61, %v1879_v39  ;;  %v832_v52 = vunpack.c.h.bf16 %v818_v44  ;;  %v835_v57 = vunpack.c.l.bf16 %v820_v47  ;;  %v836_v42 = vunpack.c.h.bf16 %v820_v47 }
 0x12b   : > { %v879_v51 = vadd.f32 1.0, %v863_v46  ;;  %v880_v54 = vadd.f32 1.0, %v864_v62  ;;  %1890 = vtanh.f32 %v831_v49  ;;  %v2452_v58 = vmul.f32 0.5, %v2357_v22 }
 0x12c   : > { %v867_v45 = vunpack.c.l.bf16 %v856_v48  ;;  %v868_v56 = vunpack.c.h.bf16 %v856_v48  ;;  %v1883_v60 = vpop.eup %1882  ;;  %1892 = vtanh.f32 %v832_v52  ;;  %v624_v31 = vmul.f32 0.5, %v2361_v28 }
 0x12d   : > { %v894_v59 = vpack.c.bf16 %v880_v54, %v879_v51  ;;  %v1885_v4 = vpop.eup %1884  ;;  %1894 = vtanh.f32 %v835_v57  ;;  %v635_v32 = vpack.c.bf16 %v626_v41, %v625_v40  ;;  %v909_v1 = vunpack.c.l.bf16 %v2448_v55 }
 0x12e   : > { %v883_v7 = vadd.f32 1.0, %v867_v45  ;;  %v884_v10 = vadd.f32 1.0, %v868_v56  ;;  %v1887_v11 = vpop.eup %1886  ;;  %v857_v16 = vpack.c.bf16 %v1885_v4, %v1883_v60  ;;  %1896 = vtanh.f32 %v836_v42 }
 0x12f   : > { %v919_v12 = vunpack.c.l.bf16 %v894_v59  ;;  %v920_v15 = vunpack.c.h.bf16 %v894_v59  ;;  %v1889_v17 = vpop.eup %1888  ;;  %v627_v22 = vmul.f32 0.5, %v2387_v14  ;;  %v910_v24 = vunpack.c.h.bf16 %v2448_v55 }
 0x130   : > { %v896_v19 = vpack.c.bf16 %v884_v10, %v883_v7  ;;  %v859_v21 = vpack.c.bf16 %v1889_v17, %v1887_v11  ;;  %v869_v23 = vunpack.c.l.bf16 %v857_v16  ;;  %v628_v63 = vmul.f32 0.5, %v2391_v18 }
 0x131   : > { %v1891_v28 = vpop.eup %1890  ;;  %v935_v26 = vmul.f32 %v919_v12, %v903_v35  ;;  %v870_v9 = vunpack.c.h.bf16 %v857_v16  ;;  %v936_v0 = vmul.f32 %v920_v15, %v904_v37  ;;  %v913_v20 = vunpack.c.l.bf16 %v635_v32 }
 0x132   : > { %v923_v25 = vunpack.c.l.bf16 %v896_v19  ;;  %v924_v2 = vunpack.c.h.bf16 %v896_v19  ;;  %v1893_v43 = vpop.eup %1892  ;;  %v873_v8 = vunpack.c.l.bf16 %v859_v21  ;;  %v874_v53 = vunpack.c.h.bf16 %v859_v21 }
 0x133   : > { %v885_v13 = vadd.f32 1.0, %v869_v23  ;;  %v1895_v50 = vpop.eup %1894  ;;  %v886_v30 = vadd.f32 1.0, %v870_v9  ;;  %v858_v33 = vpack.c.bf16 %v1893_v43, %v1891_v28  ;;  %v914_v5 = vunpack.c.h.bf16 %v635_v32  ;;  %v1865_v28 = vld [vmem:[%s2504_s4] ss:$0 sm:$0xff] }
 0x134   : > { %v939_v14 = vmul.f32 %v923_v25, %v907_v34  ;;  %v940_v29 = vmul.f32 %v924_v2, %v908_v3  ;;  %v1897_v27 = vpop.eup %1896  ;;  %v889_v38 = vadd.f32 1.0, %v873_v8  ;;  %v890_v18 = vadd.f32 1.0, %v874_v53 }
 0x135   : > { %v897_v39 = vpack.c.bf16 %v886_v30, %v885_v13  ;;  %v860_v40 = vpack.c.bf16 %v1897_v27, %v1895_v50  ;;  %v636_v41 = vpack.c.bf16 %v628_v63, %v627_v22  ;;  %v871_v44 = vunpack.c.l.bf16 %v858_v33 }
 0x136   : > { %v951_v35 = vpack.c.bf16 %v939_v14, %v935_v26  ;;  %v952_v6 = vpack.c.bf16 %v940_v29, %v936_v0  ;;  %v899_v37 = vpack.c.bf16 %v890_v18, %v889_v38  ;;  %v872_v61 = vunpack.c.h.bf16 %v858_v33 }
 0x137   : > { %v925_v36 = vunpack.c.l.bf16 %v897_v39  ;;  %v926_v34 = vunpack.c.h.bf16 %v897_v39  ;;  %v875_v46 = vunpack.c.l.bf16 %v860_v40  ;;  %v876_v62 = vunpack.c.h.bf16 %v860_v40 }
 0x138   : > { %1263 = vmatmul.bf16.vlgmr.msrb.gmra.mxu2 %v951_v35  ;;  %1282 = vmatmul.bf16.vlgmr.msrb.gmra.mxu3 %v952_v6  ;;  %v929_v47 = vunpack.c.l.bf16 %v899_v37  ;;  %v930_v48 = vunpack.c.h.bf16 %v899_v37  ;;  %v887_v49 = vadd.f32 1.0, %v871_v44  ;;  %v888_v52 = vadd.f32 1.0, %v872_v61 }
 0x139   : > { %v941_v51 = vmul.f32 %v925_v36, %v909_v1  ;;  %v891_v54 = vadd.f32 1.0, %v875_v46  ;;  %v892_v57 = vadd.f32 1.0, %v876_v62  ;;  %v942_v45 = vmul.f32 %v926_v34, %v910_v24 }
 0x13a   : > { %v945_v42 = vmul.f32 %v929_v47, %v913_v20  ;;  %v946_v56 = vmul.f32 %v930_v48, %v914_v5  ;;  %v898_v55 = vpack.c.bf16 %v888_v52, %v887_v49  ;;  %v634_v60 = vpack.c.bf16 %v624_v31, %v2452_v58 }
 0x13b   : > { %v900_v59 = vpack.c.bf16 %v892_v57, %v891_v54  ;;  %v915_v7 = vunpack.c.l.bf16 %v636_v41  ;;  %v916_v10 = vunpack.c.h.bf16 %v636_v41 }
 0x13c   : > { %v953_v3 = vpack.c.bf16 %v945_v42, %v941_v51  ;;  %v954_v4 = vpack.c.bf16 %v946_v56, %v942_v45  ;;  %v927_v11 = vunpack.c.l.bf16 %v898_v55  ;;  %v928_v15 = vunpack.c.h.bf16 %v898_v55 }
 0x13d   : > { %v931_v12 = vunpack.c.l.bf16 %v900_v59  ;;  %v932_v16 = vunpack.c.h.bf16 %v900_v59  ;;  %v911_v17 = vunpack.c.l.bf16 %v634_v60  ;;  %v912_v32 = vunpack.c.h.bf16 %v634_v60 }
 0x13e   : > { %1230 = vmatmul.bf16.gmra.mxu0 %v953_v3  ;;  %1249 = vmatmul.bf16.gmra.mxu1 %v954_v4 }
 0x13f   : > { %v947_v19 = vmul.f32 %v931_v12, %v915_v7  ;;  %v948_v1 = vmul.f32 %v932_v16, %v916_v10  ;;  %v943_v22 = vmul.f32 %v927_v11, %v911_v17  ;;  %v944_v21 = vmul.f32 %v928_v15, %v912_v32 }
 0x141   : > { %v955_v23 = vpack.c.bf16 %v947_v19, %v943_v22  ;;  %v956_v24 = vpack.c.bf16 %v948_v1, %v944_v21 }
 0x148   : > { %1268 = vmatmul.bf16.gmra.mxu2 %v955_v23  ;;  %1287 = vmatmul.bf16.gmra.mxu3 %v956_v24 }
 0x1a0   : > { %v1226_v58 = vpop.f32.mrf.mxu0  ;;  %v1245_v31 = vpop.f32.mrf.mxu1 }
 0x1a1   : > { %v1227_v2 = vadd.f32 %v1865_v28, %v1226_v58 }
 0x1a3   : > { %v1246_v0 = vadd.f32 %v1245_v31, %v1227_v2 }
 0x1a8   : > { %v1228_v63 = vpop.f32.mrf.mxu0  ;;  %v1247_v9 = vpop.f32.mrf.mxu1 }
 0x1a9   : > { %v1229_v43 = vadd.f32 %v1865_v28, %v1228_v63 }
 0x1ab   : > { %v1248_v53 = vadd.f32 %v1247_v9, %v1229_v43 }
 0x1bb   : > { %v1264_v25 = vpop.f32.mrf.mxu2  ;;  %v1283_v26 = vpop.f32.mrf.mxu3 }
 0x1bc   : > { %v1231_v8 = vpop.f32.mrf.mxu0  ;;  %v1265_v13 = vadd.f32 %v1264_v25, %v1246_v0  ;;  %v1250_v27 = vpop.f32.mrf.mxu1 }
 0x1bd   : > { %v1232_v35 = vadd.f32 %v1865_v28, %v1231_v8 }
 0x1be   : > { %v1284_v30 = vadd.f32 %v1283_v26, %v1265_v13 }
 0x1bf   : > { %v1251_v39 = vadd.f32 %v1250_v27, %v1232_v35 }
 0x1c3   : > { %v1266_v50 = vpop.f32.mrf.mxu2  ;;  %v1285_v14 = vpop.f32.mrf.mxu3 }
 0x1c4   : > { %v1267_v29 = vadd.f32 %v1266_v50, %v1248_v53  ;;  %v1233_v18 = vpop.f32.mrf.mxu0  ;;  %v1252_v40 = vpop.f32.mrf.mxu1 }
 0x1c5   : > { %v1234_v6 = vadd.f32 %v1865_v28, %v1233_v18 }
 0x1c6   : > { %v1286_v33 = vadd.f32 %v1285_v14, %v1267_v29 }
 0x1c7   : > { %v1253_v37 = vadd.f32 %v1252_v40, %v1234_v6 }
 0x1c8   : > { %v1774_v38 = vpack.c.bf16 %v1286_v33, %v1284_v30 }
 0x1ca   : > { %1775 = vst [vmem:[%s292_s28] sm:$0xff] %v1774_v38  }
 0x1cb   : > { %v1269_v20 = vpop.f32.mrf.mxu2  ;;  %v1288_v5 = vpop.f32.mrf.mxu3 }
 0x1cc   : > { %v1270_v41 = vadd.f32 %v1269_v20, %v1251_v39 }
 0x1ce   : > { %v1289_v34 = vadd.f32 %v1288_v5, %v1270_v41 }
 0x1d3   : > { %v1271_v44 = vpop.f32.mrf.mxu2  ;;  %v1290_v36 = vpop.f32.mrf.mxu3 }
 0x1d4   : > { %v1272_v61 = vadd.f32 %v1271_v44, %v1253_v37 }
 0x1d6   : > { %v1291_v46 = vadd.f32 %v1290_v36, %v1272_v61 }
 0x1d8   : > { %v1779_v62 = vpack.c.bf16 %v1291_v46, %v1289_v34 }
 0x1da   : > { %1781 = vst [vmem:[%s292_s28 + $0x8] sm:$0xff] %v1779_v62  }
 0x1db   : > { %2045 = shalt.err (!%p2042_p10)
}
 0x1dc   : > { %s2101_s17 = smov 64   ;;  %s2102_s29 = smov 4  }
 0x1dd   : > { %1796 = dma.vmem_to_hbm [thread:$0]  (%p2218_p3), %s1315_s13, 256, %s1317_s12, %s1302_s22, %s2101_s17, %s2101_s17, %s2102_s29  }
 0x1de PF: > { %s1331_s28 = sand.u32 1, %s2080_s18   ;;  %p2514_p12 = scmp.ge.s32.totalorder %s2092_s21, 2 }
 0x1df   : > { %s1332_s16 = scalar_lea.sflag [#allocation4], %s1331_s28 }
 0x1e0   : > { %p1813_p13 = pnand %p2514_p12, %p2168_p6 }
 0x1e2   : > { %p1814_p0 = pneg %p1813_p13 }
 0x1e4   : > { %2075 = dma.done.wait (%p1814_p0), %s1332_s16, 256  }
 0x1e5   : > { %2077 = vsyncadd (%p1814_p0), %s1332_s16, 4294967040  ;;  %p20_p5 = scmp.ge.s32.totalorder %s2205_s30, 4   ;;  %s2515_s18 = smov %s2084_s19 }
 0x1e6   : > { %s2516_s19 = smov %s2088_s20  ;;  %s2517_s20 = smov %s2214_s9 }
 0x1e7   : > { %s2518_s21 = smov %s2205_s30  ;;  %22 = sbr.rel (!%p20_p5) target bundleno = 7 (0x7), region = 97 }
 0x1ec   :  { %1338 = vsyncpa [#allocation3], 1 }
 0x1ed   :  { %1340 = vsyncpa [#allocation3 + $0x1], 1 }
 0x1ee   :  { %1341 = vsyncpa [#allocation6], 1 }
 0x1ef   :  { %1342 = vsyncpa [#allocation9], 1 }
 0x1f0   :  { %1343 = vsyncpa [#allocation4], 1 }
 0x1f1   :  { %1345 = vsyncpa [#allocation4 + $0x1], 1 }

</bundles_post_ra>
